<compile_context>
chip_gen: v6e
topology: v6e:2x2x1
jax: 0.10.0
libtpu: 0.0.40
codegen_flags: <defaults>
</compile_context>

<pallas_src>
import jax
import jax.numpy as jnp
from jax.experimental import pallas as pl
from jax.experimental.pallas import tpu as pltpu


def _make_rescale_kernel(scale: float):
    scale = float(scale)
    inv_scale = 1.0 / scale  # exact hoisted scalar reciprocal (trace-time const)

    def kernel(x_ref, o_ref):
        x = x_ref[...]
        # Compute in f32 (v5e VPU has no bf16 ALUs); jnp.round matches
        # torch.round (round-half-to-even).
        y = jnp.round(x.astype(jnp.float32) * scale) * inv_scale
        o_ref[...] = y.astype(o_ref.dtype)

    return kernel


def rescale(x: jax.Array, scale: float = 255.0) -> jax.Array:
    """Elementwise y = round(x * scale) / scale via a Pallas TPU kernel."""
    orig_shape = x.shape
    orig_dtype = x.dtype
    n = x.size
    if n == 0:
        return x

    # Stream in the input's native float dtype; promote non-floats to f32.
    if jnp.issubdtype(orig_dtype, jnp.floating):
        io_dtype = orig_dtype
    else:
        io_dtype = jnp.float32
    xf = x if x.dtype == io_dtype else x.astype(io_dtype)

    # Pick the widest lane-dense slab width that divides n (no padding).
    lane = None
    for cand in (2048, 1024, 512, 256, 128):
        if n % cand == 0:
            lane = cand
            break
    pad = 0
    if lane is None:
        lane = 128
        pad = (-n) % lane  # rare fallback: minimal pad to a 128 multiple

    flat = xf.reshape(-1)
    if pad:
        flat = jnp.pad(flat, (0, pad))
    rows = flat.size // lane
    x2d = flat.reshape(rows, lane)

    # ~2 MiB blocks: big enough for ~90% of HBM roofline, small enough that
    # double-buffered in+out (~8 MiB) fits default scoped VMEM on v5e/v6e/v7x.
    bytes_per = jnp.dtype(io_dtype).itemsize
    target_block_bytes = 2 * 1024 * 1024
    tile_rows = max(8, target_block_bytes // (lane * bytes_per))
    tile_rows -= tile_rows % 8
    if tile_rows >= rows:
        tile_rows = rows          # whole-array block (always legal: full dim)
        grid = (1,)
    else:
        grid = (pl.cdiv(rows, tile_rows),)  # ragged last block handled by Pallas

    kernel = _make_rescale_kernel(scale)

    out2d = pl.pallas_call(
        kernel,
        out_shape=jax.ShapeDtypeStruct((rows, lane), io_dtype),
        grid_spec=pltpu.PrefetchScalarGridSpec(
            num_scalar_prefetch=0,
            grid=grid,
            in_specs=[pl.BlockSpec((tile_rows, lane), lambda i: (i, 0))],
            out_specs=pl.BlockSpec((tile_rows, lane), lambda i: (i, 0)),
        ),
        compiler_params=pltpu.CompilerParams(
            dimension_semantics=("parallel",),  # megacore sharding on v7x
        ),
    )(x2d)

    out_flat = out2d.reshape(-1)
    if pad:
        out_flat = out_flat[:n]
    out = out_flat.reshape(orig_shape)
    if out.dtype != orig_dtype:
        out = out.astype(orig_dtype)
    return out


if __name__ == "__main__":
    key = jax.random.PRNGKey(0)
    # Small NCHW batch consistent with an image-pipeline transform.
    x = jax.random.uniform(key, (2, 4, 16, 16), dtype=jnp.float32)

    y = rescale(x, scale=255.0)
    jax.block_until_ready(y)

    # Reference check in plain JAX (same semantics as the torch module).
    y_ref = jnp.round(x * 255.0) / 255.0
    assert y.shape == x.shape and y.dtype == x.dtype
    assert jnp.max(jnp.abs(y - y_ref)) < 1e-6

    print("KERNEL_OK")
</pallas_src>

<mosaic_0001>
module attributes {stable_mosaic.version = 11 : i64} {
  func.func @kernel(%arg0: i32, %arg1: memref<1x2048xf32, #tpu.memory_space<vmem>>, %arg2: memref<1x2048xf32, #tpu.memory_space<vmem>>) attributes {dimension_semantics = [#tpu.dimension_semantics<parallel>], iteration_bounds = array<i64: 1>, scalar_prefetch = 0 : i64, scratch_operands = 0 : i64, tpu.core_type = #tpu.core_type<tc>, window_params = [{transform_indices = @transform_0, window_bounds = array<i64: 1, 2048>}, {transform_indices = @transform_1, window_bounds = array<i64: 1, 2048>}]} {
    %c0 = arith.constant 0 : index
    %c0_0 = arith.constant 0 : index
    %0 = vector.load %arg1[%c0, %c0_0] : memref<1x2048xf32, #tpu.memory_space<vmem>>, vector<1x2048xf32>
    %cst = arith.constant 2.550000e+02 : f32
    %1 = vector.broadcast %cst : f32 to vector<1x2048xf32>
    %2 = arith.mulf %0, %1 : vector<1x2048xf32>
    %3 = math.roundeven %2 : vector<1x2048xf32>
    %cst_1 = arith.constant 0.00392156886 : f32
    %4 = vector.broadcast %cst_1 : f32 to vector<1x2048xf32>
    %5 = arith.mulf %3, %4 : vector<1x2048xf32>
    %c0_2 = arith.constant 0 : index
    %c0_3 = arith.constant 0 : index
    %6 = vector.load %arg2[%c0_2, %c0_3] : memref<1x2048xf32, #tpu.memory_space<vmem>>, vector<1x2048xf32>
    tpu.vector_store %arg2[%c0_2, %c0_3], %5 {strides = array<i32>} : memref<1x2048xf32, #tpu.memory_space<vmem>>, vector<1x2048xf32>,
    return
  }
  func.func @transform_0(%arg0: i32) -> (i32, i32) {
    %c0_i32 = arith.constant 0 : i32
    %c0_i32_0 = arith.constant 0 : i32
    return %arg0, %c0_i32 : i32, i32
  }
  func.func @transform_1(%arg0: i32) -> (i32, i32) {
    %c0_i32 = arith.constant 0 : i32
    %c0_i32_0 = arith.constant 0 : i32
    return %arg0, %c0_i32 : i32, i32
  }
}

</mosaic_0001>

<bundles_post_ra>
// kernel: tpu_custom_call.1
= control target key start
LH: loop header
LB: loop body
LE: loop exit
PB: predicated region body
PF: predicated region fallthrough
CT: control target
= control target key end

     0   :  { %6 = vsyncpa [#allocation3], 0  ;;  %s126_s0 = inlined_call_operand.hbm [shape: f32[1,2048], index: 0, kind: input, shape index: {}]   ;;  %s127_s1 = inlined_call_operand.hbm [shape: f32[1,2048], index: 1, kind: output, shape index: {}]  }
   0x1   :  { %7 = vsyncpa [#allocation4], 0  ;;  %s108_s6 = smov [#allocation2]  }
   0x2   :  { %s14_s7 = sshll.u32 %s108_s6, 4  ;;  %s15_s7 = int_to_ptr.vmem [resolvable:$true] %s14_s7 }
   0x3   :  { %s72_s8 = scalar_lea.vmem %s15_s7, 256  ;;  %p77_p1 = scmp.lt.s32.totalorder %s15_s7, %s15_s7 }
   0x4   :  { %p73_p0 = scmp.ne.s32.totalorder %s15_s7, %s72_s8  ;;  %p78_p2 = scmp.lt.s32.totalorder %s72_s8, %s72_s8 }
   0x6   :  { %p79_p3 = por %p78_p2, %p77_p1 }
   0x8   :  { %p80_p4 = pnand %p79_p3, %p73_p0 }
   0xa   :  { %83 = shalt.err (!%p80_p4)
}
   0xb   :  { %17 = dma.hbm_to_vmem [thread:$0]  %s126_s0, 256, %s15_s7, [#allocation3]  }
   0xc   :  { %104 = dma.done.wait [#allocation3], 256  }
   0xd   :  { %105 = vsyncadd [#allocation3], 4294967040  ;;  %v21_v0 = vld [vmem:[#allocation2] sm:$0xff]  ;;  %v22_v1 = vld [vmem:[#allocation2 + $0x8] sm:$0xff]  ;;  %s109_s0 = smov [#allocation5]  }
   0xe   :  { %v23_v2 = vmul.f32 255.0, %v21_v0  ;;  %v24_v3 = vmul.f32 255.0, %v22_v1  ;;  %s37_s11 = sshll.u32 %s109_s0, 4  ;;  %s38_s11 = int_to_ptr.vmem [resolvable:$true] %s37_s11 }
   0xf   :  { %s84_s12 = scalar_lea.vmem %s38_s11, 256  ;;  %p89_p6 = scmp.lt.s32.totalorder %s38_s11, %s38_s11 }
  0x10   :  { %v48_v4 = vcvt.f32.s32 %v23_v2  ;;  %v46_v5 = vand.u32 2147483647, %v23_v2  ;;  %v56_v6 = vcvt.f32.s32 %v24_v3  ;;  %v51_v8 = vand.u32 2147483648, %v23_v2  ;;  %p85_p5 = scmp.ne.s32.totalorder %s38_s11, %s84_s12  ;;  %p90_p7 = scmp.lt.s32.totalorder %s84_s12, %s84_s12 }
  0x11   :  { %v54_v9 = vand.u32 2147483647, %v24_v3  ;;  %v59_v11 = vand.u32 2147483648, %v24_v3 }
  0x12   :  { %v49_v7 = vcvt.s32.f32 %v48_v4  ;;  %v57_v10 = vcvt.s32.f32 %v56_v6  ;;  %vm47_vm0 = vcmp.lt.f32.partialorder %v46_v5, 8388608.0  ;;  %p91_p8 = por %p90_p7, %p89_p6 }
  0x13   :  { %vm55_vm1 = vcmp.lt.f32.partialorder %v54_v9, 8388608.0 }
  0x14   :  { %v50_v12 = vand.u32 2147483647, %v49_v7  ;;  %v58_v13 = vand.u32 2147483647, %v57_v10  ;;  %p92_p9 = pnand %p91_p8, %p85_p5 }
  0x16   :  { %v52_v14 = vor.u32 %v51_v8, %v50_v12  ;;  %v60_v15 = vor.u32 %v59_v11, %v58_v13 }
  0x18   :  { %v53_v16 = vsel %vm47_vm0, %v52_v14, %v23_v2  ;;  %v61_v18 = vsel %vm55_vm1, %v60_v15, %v24_v3 }
  0x19   :  { %v27_v17 = vmul.f32 0.003921569, %v53_v16  ;;  %v28_v19 = vmul.f32 0.003921569, %v61_v18 }
  0x1b   :  { %29 = vst [vmem:[#allocation5] sm:$0xff] %v27_v17  ;;  %30 = vst [vmem:[#allocation5 + $0x8] sm:$0xff] %v28_v19 }
  0x1c   :  { %95 = shalt.err (!%p92_p9)
}
  0x1d   :  { %40 = dma.vmem_to_hbm [thread:$0]  %s38_s11, 256, %s127_s1, [#allocation4]  }
  0x1e   :  { %106 = dma.done.wait [#allocation4], 256  }
  0x1f   :  { %107 = vsyncadd [#allocation4], 4294967040 }
  0x20   :  { %44 = vsyncpa [#allocation3], 1 }
  0x21   :  { %45 = vsyncpa [#allocation4], 1 }

</bundles_post_ra>
